<compile_context>
chip_gen: v6e
topology: v6e:2x2x1
jax: 0.10.0
libtpu: 0.0.40
codegen_flags: <defaults>
</compile_context>

<pallas_src>
import jax
import jax.numpy as jnp
from jax.experimental import pallas as pl
from jax.experimental.pallas import tpu as pltpu

_LANE = 128
_MAX_TILE_ROWS = 4096                 # rows per grid step (x 128 lanes)
_STEP_BYTE_BUDGET = 6 * 1024 * 1024   # in+out bytes per pipeline step; x2 buffers
                                      # stays under v5e's 16 MiB scoped VMEM
_MIN_PALLAS_ELEMS = 1 << 15           # below this a fused XLA convert wins
_MIN_SPLIT_ROWS = 1024                # above this, force >=2 steps (v7x dual TC)


def _round_up(x: int, m: int) -> int:
    return ((x + m - 1) // m) * m


def _round_down(x: int, m: int) -> int:
    return (x // m) * m


def _cast_to_f32_kernel(x_ref, o_ref):
    # Elementwise cast (matches torch.as_tensor(..., dtype=torch.float32)).
    o_ref[...] = x_ref[...].astype(jnp.float32)


def _pick_tile_rows(rows: int, sublane: int, cap_rows: int):
    """Pick a legal, budget-respecting row tile.  Returns None if nothing fits."""
    if rows <= cap_rows:
        tile = rows  # full second-minor dim: always a legal block shape
        if rows >= _MIN_SPLIT_ROWS:
            # Ensure >= 2 grid steps so both v7x TensorCores get work.
            half = _round_up(pl.cdiv(rows, 2), sublane)
            if half < rows:
                tile = half
        return tile
    tile = _round_down(cap_rows, sublane)
    return tile if tile >= sublane else None


def _cast_2d(x2d: jax.Array, tile_rows: int, bytes_accessed: int) -> jax.Array:
    rows, lane = x2d.shape
    grid = (pl.cdiv(rows, tile_rows),)
    return pl.pallas_call(
        _cast_to_f32_kernel,
        out_shape=jax.ShapeDtypeStruct((rows, lane), jnp.float32),
        grid=grid,
        in_specs=[pl.BlockSpec((tile_rows, lane), lambda i: (i, 0))],
        out_specs=pl.BlockSpec((tile_rows, lane), lambda i: (i, 0)),
        compiler_params=pltpu.CompilerParams(
            dimension_semantics=("parallel",)),
        cost_estimate=pl.CostEstimate(
            flops=0, transcendentals=0, bytes_accessed=bytes_accessed),
    )(x2d)


def np2dict_tensor_forward(observations: jax.Array, *, force_pallas: bool = False) -> dict:
    """JAX/Pallas equivalent of np2dict_tensor.forward.

    Args:
      observations: array of any shape / numeric dtype (module implies
        [batch, state_dim] or [state_dim]).
      force_pallas: skip the small-input fast path (testing only).

    Returns:
      {'state': float32 array with the same shape as `observations`}
    """
    x = observations
    orig_shape = x.shape
    n = int(x.size)
    in_item = jnp.dtype(x.dtype).itemsize
    sublane = max(8, 32 // max(1, in_item))  # f32: 8, bf16: 16, int8: 32

    # Fast path: for the module's real shapes (batch x state_dim ~ 64 elems)
    # the pallas_call custom-call boundary dominates; a fused convert wins.
    if n == 0 or (not force_pallas and n < _MIN_PALLAS_ELEMS):
        return {"state": x.astype(jnp.float32)}

    bytes_accessed = n * (in_item + 4)

    if n % _LANE == 0:
        # Lane-aligned: free reshape to [rows, 128]; no pad, no post-slice.
        rows, lane = n // _LANE, _LANE
    else:
        # Unaligned element count: keep a 2-D view whose trailing dim equals
        # the original trailing dim (block legal via "equal full array dims").
        lane = orig_shape[-1] if x.ndim >= 1 else 1
        rows = n // lane

    cap_rows = min(_MAX_TILE_ROWS, _STEP_BYTE_BUDGET // (lane * (in_item + 4)))
    tile_rows = _pick_tile_rows(rows, sublane, cap_rows) if cap_rows >= 1 else None
    if tile_rows is None:
        # TODO(synk): pathological trailing dim too large for a single VMEM
        # block; fall back to the fused XLA convert (identical semantics).
        return {"state": x.astype(jnp.float32)}

    x2d = x.reshape(rows, lane)                 # metadata-only reshape
    out2d = _cast_2d(x2d, tile_rows, bytes_accessed)
    return {"state": out2d.reshape(orig_shape)}  # metadata-only reshape


if __name__ == "__main__":
    key = jax.random.PRNGKey(0)
    batch, state_dim = 2, 32  # module spec: input_shape = (32,)

    # Deterministic synthetic observations; non-float32 dtype so the cast is
    # actually exercised.
    obs = jax.random.normal(key, (batch, state_dim), dtype=jnp.float32).astype(
        jnp.bfloat16)

    # 1) Module-scale input: fast path (fused convert).
    out = np2dict_tensor_forward(obs)
    jax.block_until_ready(out["state"])
    assert out["state"].dtype == jnp.float32
    assert out["state"].shape == (batch, state_dim)
    assert jnp.allclose(out["state"], obs.astype(jnp.float32))

    # 2) Same small input, forced through the Pallas kernel (full-dim block,
    #    non-lane-aligned branch).
    out_k = np2dict_tensor_forward(obs, force_pallas=True)
    jax.block_until_ready(out_k["state"])
    assert out_k["state"].dtype == jnp.float32
    assert jnp.allclose(out_k["state"], obs.astype(jnp.float32))

    # 3) Larger batch: lane-aligned kernel path, >=2-step parallel grid,
    #    no pad / slice anywhere in the wrapper.
    big = jax.random.normal(key, (4096, 96), dtype=jnp.float32).astype(jnp.bfloat16)
    out_big = np2dict_tensor_forward(big)
    jax.block_until_ready(out_big["state"])
    assert out_big["state"].dtype == jnp.float32
    assert out_big["state"].shape == big.shape
    assert jnp.allclose(out_big["state"], big.astype(jnp.float32))

    print("KERNEL_OK")
</pallas_src>

<mosaic_0001>
module attributes {stable_mosaic.version = 11 : i64} {
  func.func @_cast_to_f32_kernel(%arg0: i32, %arg1: memref<2x32xbf16, #tpu.memory_space<vmem>>, %arg2: memref<2x32xf32, #tpu.memory_space<vmem>>) attributes {dimension_semantics = [#tpu.dimension_semantics<parallel>], iteration_bounds = array<i64: 1>, scalar_prefetch = 0 : i64, scratch_operands = 0 : i64, tpu.core_type = #tpu.core_type<tc>, window_params = [{transform_indices = @transform_0, window_bounds = array<i64: 2, 32>}, {transform_indices = @transform_1, window_bounds = array<i64: 2, 32>}]} {
    %c0 = arith.constant 0 : index
    %c0_0 = arith.constant 0 : index
    %0 = vector.load %arg1[%c0, %c0_0] : memref<2x32xbf16, #tpu.memory_space<vmem>>, vector<2x32xbf16>
    %1 = arith.extf %0 : vector<2x32xbf16> to vector<2x32xf32>
    %c0_1 = arith.constant 0 : index
    %c0_2 = arith.constant 0 : index
    %2 = vector.load %arg2[%c0_1, %c0_2] : memref<2x32xf32, #tpu.memory_space<vmem>>, vector<2x32xf32>
    tpu.vector_store %arg2[%c0_1, %c0_2], %1 {strides = array<i32>} : memref<2x32xf32, #tpu.memory_space<vmem>>, vector<2x32xf32>,
    return
  }
  func.func @transform_0(%arg0: i32) -> (i32, i32) {
    %c0_i32 = arith.constant 0 : i32
    %c0_i32_0 = arith.constant 0 : i32
    return %arg0, %c0_i32 : i32, i32
  }
  func.func @transform_1(%arg0: i32) -> (i32, i32) {
    %c0_i32 = arith.constant 0 : i32
    %c0_i32_0 = arith.constant 0 : i32
    return %arg0, %c0_i32 : i32, i32
  }
}

</mosaic_0001>

<bundles_post_ra>
// kernel: tpu_custom_call.1
= control target key start
LH: loop header
LB: loop body
LE: loop exit
PB: predicated region body
PF: predicated region fallthrough
CT: control target
= control target key end

     0   :  { %6 = vsyncpa [#allocation3], 0  ;;  %s104_s0 = inlined_call_operand.hbm [shape: bf16[2,32], index: 0, kind: input, shape index: {}]   ;;  %s105_s1 = inlined_call_operand.hbm [shape: f32[2,32], index: 1, kind: output, shape index: {}]  }
   0x1   :  { %7 = vsyncpa [#allocation4], 0  ;;  %s86_s6 = smov [#allocation2]  }
   0x2   :  { %s14_s7 = sshll.u32 %s86_s6, 4  ;;  %s15_s7 = int_to_ptr.vmem [resolvable:$true] %s14_s7 }
   0x3   :  { %s50_s8 = scalar_lea.vmem %s15_s7, 16  ;;  %s54_s9 = scalar_lea.vmem %s15_s7, 32 }
   0x4   :  { %p51_p0 = scmp.ne.s32.totalorder %s15_s7, %s50_s8  ;;  %p55_p1 = scmp.lt.s32.totalorder %s15_s7, %s15_s7 }
   0x5   :  { %p56_p2 = scmp.lt.s32.totalorder %s54_s9, %s50_s8 }
   0x7   :  { %p57_p3 = por %p56_p2, %p55_p1 }
   0x9   :  { %p58_p4 = pnand %p57_p3, %p51_p0 }
   0xb   :  { %61 = shalt.err (!%p58_p4)
}
   0xc   :  { %17 = dma.hbm_to_vmem [thread:$0]  %s104_s0, 16, %s15_s7, [#allocation3]  }
   0xd   :  { %82 = dma.done.wait [#allocation3], 16  }
   0xe   :  { %83 = vsyncadd [#allocation3], 4294967280  ;;  %s87_s12 = smov [#allocation5]   ;;  %v21_v0 = vld [vmem:[#allocation2] sm:$0x1]  ;;  %vm23_vm0 = vcmask 254976  }
   0xf   :  { %s31_s13 = sshll.u32 %s87_s12, 4  ;;  %v22_v1 = vunpack.c.l.bf16 %v21_v0  ;;  %s32_s13 = int_to_ptr.vmem [resolvable:$true] %s31_s13 }
  0x10   :  { %s62_s14 = scalar_lea.vmem %s32_s13, 32  ;;  %p67_p6 = scmp.lt.s32.totalorder %s32_s13, %s32_s13 }
  0x11   :  { %24 = vst.msk [vmem:[#allocation5] sm:$0x3] %vm23_vm0, %v22_v1  ;;  %p63_p5 = scmp.ne.s32.totalorder %s32_s13, %s62_s14  ;;  %p68_p7 = scmp.lt.s32.totalorder %s62_s14, %s62_s14 }
  0x13   :  { %p69_p8 = por %p68_p7, %p67_p6 }
  0x15   :  { %p70_p9 = pnand %p69_p8, %p63_p5 }
  0x17   :  { %73 = shalt.err (!%p70_p9)
}
  0x18   :  { %34 = dma.vmem_to_hbm [thread:$0]  %s32_s13, 32, %s105_s1, [#allocation4]  }
  0x19   :  { %84 = dma.done.wait [#allocation4], 32  }
  0x1a   :  { %85 = vsyncadd [#allocation4], 4294967264 }
  0x1b   :  { %38 = vsyncpa [#allocation3], 1 }
  0x1c   :  { %39 = vsyncpa [#allocation4], 1 }

</bundles_post_ra>
